<compile_context>
chip_gen: v5e
topology: v5e:2x2
jax: 0.10.0
libtpu: 0.0.40
codegen_flags: <defaults>
</compile_context>

<pallas_src>
import numpy as np
import jax
import jax.numpy as jnp
from jax.experimental import pallas as pl
from jax.experimental.pallas import tpu as pltpu

_VMEM = pl.BlockSpec(memory_space=pltpu.MemorySpace.VMEM)

_H = _W = 5            # spatial size forced by Linear(n_feature + 32 + 8, ...)


# ------------------------------- the kernel ---------------------------------

def _net_kernel(img_ref, x_ref, w1_ref, w2_ref, wh1_ref, wh2_ref, wh3_ref,
                wo_ref, b_ref, o_ref):
    """Entire Net forward, fully VMEM resident (5 matmuls + epilogues)."""
    f32 = jnp.float32
    bias = b_ref[...]                                              # (6, 128) f32

    # ---- stage 1: conv1 + ReLU + 2x2 MaxPool, BOTH branches, one matmul ----
    y1 = jnp.dot(img_ref[...], w1_ref[...], preferred_element_type=f32)  # (B, 512)
    m1 = jnp.maximum(jnp.maximum(y1[:, 0:128], y1[:, 128:256]),          # pool-phase max
                     jnp.maximum(y1[:, 256:384], y1[:, 384:512]))
    pooled1 = jnp.maximum(m1 + bias[0:1, :], 0.0)                        # (B, 128)
    # pooled1 cols = [d (pos, c) 64 | h (pos, c) 64] == conv2 im2col rows.

    # ---- stage 2: conv2 + ReLU + MaxPool -> (B, 40) features, one matmul ---
    y2 = jnp.dot(pooled1.astype(jnp.bfloat16), w2_ref[...],
                 preferred_element_type=f32)                             # (B, 512)
    m2 = jnp.maximum(jnp.maximum(y2[:, 0:128], y2[:, 128:256]),          # 2x2 -> 1x1 pool
                     jnp.maximum(y2[:, 256:384], y2[:, 384:512]))
    feat = jnp.maximum(m2[:, 0:40] + bias[1:2, 0:40], 0.0)               # [d 32 | h 8]

    # ---- MLP head: concat([x, d_feat, h_feat]) then 4 dense layers ---------
    n1 = wh1_ref.shape[1]
    n2 = wh2_ref.shape[1]
    n3 = wh3_ref.shape[1]
    no = wo_ref.shape[1]
    z = jnp.concatenate([x_ref[...], feat], axis=1).astype(jnp.bfloat16)  # (B, 48)
    z = jnp.maximum(jnp.dot(z, wh1_ref[...], preferred_element_type=f32)
                    + bias[2:3, 0:n1], 0.0)
    z = jnp.maximum(jnp.dot(z.astype(jnp.bfloat16), wh2_ref[...],
                            preferred_element_type=f32) + bias[3:4, 0:n2], 0.0)
    z = jnp.maximum(jnp.dot(z.astype(jnp.bfloat16), wh3_ref[...],
                            preferred_element_type=f32) + bias[4:5, 0:n3], 0.0)
    y = jnp.dot(z.astype(jnp.bfloat16), wo_ref[...],
                preferred_element_type=f32) + bias[5:6, 0:no]
    # Exact sigmoid (exp on the EUP); keeps the output strictly in [0, 1].
    o_ref[...] = 1.0 / (1.0 + jnp.exp(-y))


# ------------------------------- parameters ---------------------------------

def init_params(key, n_feature, n_hidden_1, n_hidden_2, n_hidden_3, n_output):
    """Parameters in PyTorch layout: conv weights (OC, IC, KH, KW), linear
    weights stored as (in, out)."""
    keys = jax.random.split(key, 16)

    def w(k, shape, scale=0.1):
        return scale * jax.random.normal(k, shape, dtype=jnp.float32)

    return {
        "conv1_w": w(keys[0], (16, 7, 4, 4)),   "conv1_b": w(keys[1], (16,)),
        "conv2_w": w(keys[2], (32, 16, 5, 5)),  "conv2_b": w(keys[3], (32,)),
        "hconv1_w": w(keys[4], (16, 1, 4, 4)),  "hconv1_b": w(keys[5], (16,)),
        "hconv2_w": w(keys[6], (8, 16, 5, 5)),  "hconv2_b": w(keys[7], (8,)),
        "h1_w": w(keys[8], (n_feature + 32 + 8, n_hidden_1)), "h1_b": w(keys[9], (n_hidden_1,)),
        "h2_w": w(keys[10], (n_hidden_1, n_hidden_2)),        "h2_b": w(keys[11], (n_hidden_2,)),
        "h3_w": w(keys[12], (n_hidden_2, n_hidden_3)),        "h3_b": w(keys[13], (n_hidden_3,)),
        "out_w": w(keys[14], (n_hidden_3, n_output)),         "out_b": w(keys[15], (n_output,)),
    }


def prepare_params(params, n_feature):
    """One-time packing of PyTorch-layout parameters into the kernel layout
    (structured block-diagonal conv matmul weights, packed biases, bf16)."""
    conv1_w = np.asarray(params["conv1_w"], np.float32)     # (16, 7, 4, 4)
    hconv1_w = np.asarray(params["hconv1_w"], np.float32)   # (16, 1, 4, 4)
    conv2_w = np.asarray(params["conv2_w"], np.float32)     # (32, 16, 5, 5)
    hconv2_w = np.asarray(params["hconv2_w"], np.float32)   # (8, 16, 5, 5)

    H, W = _H, _W
    OH = H + 2 * 1 - 4 + 1                                  # conv1 out -> 4
    OW = W + 2 * 1 - 4 + 1
    assert OH == 4 and OW == 4, "Net requires 5x5 spatial inputs"

    # ---- stage-1 structured weight (200, 512) ------------------------------
    # rows   : [DOP flattened (c, h, w) : 175 | host flattened (h, w) : 25]
    # cols   : phase(dh,dw) * 128 + {d: pos*16+oc, h: 64 + pos*16+oc}
    # where conv output (oh, ow) = (2*ph + dh, 2*pw + dw) and pos = ph*2 + pw.
    k1 = 7 * H * W + 1 * H * W
    w1 = np.zeros((k1, 4 * 128), np.float32)
    for oh in range(OH):
        for ow in range(OW):
            phase = (oh % 2) * 2 + (ow % 2)
            pos = (oh // 2) * 2 + (ow // 2)
            for kh in range(4):
                for kw in range(4):
                    h, w = oh - 1 + kh, ow - 1 + kw          # padding=1
                    if not (0 <= h < H and 0 <= w < W):
                        continue                             # zero padding rows
                    rows = np.arange(7) * (H * W) + h * W + w
                    cols = phase * 128 + pos * 16 + np.arange(16)
                    w1[np.ix_(rows, cols)] = conv1_w[:, :, kh, kw].T      # (c, oc)
                    hrow = 7 * H * W + h * W + w
                    hcols = phase * 128 + 64 + pos * 16 + np.arange(16)
                    w1[hrow, hcols] = hconv1_w[:, 0, kh, kw]

    # ---- stage-2 structured weight (128, 512) ------------------------------
    # rows   : [d pooled (r*2+s)*16 + c : 64 | h pooled 64 + (r*2+s)*16 + c]
    # cols   : conv2-out position pos2*128 + {d: oc (0..31), h: 32+oc, pad 88}
    # padding=2 on a 2x2 input: kernel tap (kh, kw) = (r + 2 - oh, s + 2 - ow).
    w2 = np.zeros((2 * 64, 4 * 128), np.float32)
    for oh in range(2):
        for ow in range(2):
            pos2 = oh * 2 + ow
            for r in range(2):
                for s in range(2):
                    kh, kw = r + 2 - oh, s + 2 - ow
                    rows_d = (r * 2 + s) * 16 + np.arange(16)
                    w2[np.ix_(rows_d, pos2 * 128 + np.arange(32))] = \
                        conv2_w[:, :, kh, kw].T                           # (c, oc)
                    rows_h = 64 + (r * 2 + s) * 16 + np.arange(16)
                    w2[np.ix_(rows_h, pos2 * 128 + 32 + np.arange(8))] = \
                        hconv2_w[:, :, kh, kw].T                          # (c, oc)

    # ---- biases packed into one (6, 128) f32 array -------------------------
    n1 = params["h1_b"].shape[0]
    n2 = params["h2_b"].shape[0]
    n3 = params["h3_b"].shape[0]
    no = params["out_b"].shape[0]
    assert max(n1, n2, n3, no) <= 128
    assert params["h1_w"].shape[0] == n_feature + 32 + 8
    biases = np.zeros((6, 128), np.float32)
    biases[0, 0:64] = np.tile(np.asarray(params["conv1_b"], np.float32), 4)
    biases[0, 64:128] = np.tile(np.asarray(params["hconv1_b"], np.float32), 4)
    biases[1, 0:32] = np.asarray(params["conv2_b"], np.float32)
    biases[1, 32:40] = np.asarray(params["hconv2_b"], np.float32)
    biases[2, 0:n1] = np.asarray(params["h1_b"], np.float32)
    biases[3, 0:n2] = np.asarray(params["h2_b"], np.float32)
    biases[4, 0:n3] = np.asarray(params["h3_b"], np.float32)
    biases[5, 0:no] = np.asarray(params["out_b"], np.float32)

    return {
        "w1": jnp.asarray(w1, jnp.bfloat16),
        "w2": jnp.asarray(w2, jnp.bfloat16),
        "h1_w": jnp.asarray(params["h1_w"], jnp.bfloat16),   # unsplit (48, n_h1)
        "h2_w": jnp.asarray(params["h2_w"], jnp.bfloat16),
        "h3_w": jnp.asarray(params["h3_w"], jnp.bfloat16),
        "out_w": jnp.asarray(params["out_w"], jnp.bfloat16),
        "biases": jnp.asarray(biases, jnp.float32),
    }


# ------------------------------ model forward -------------------------------

@jax.jit
def net_forward(p, x, DOP, host_DOP):
    B = x.shape[0]
    # The only XLA glue: flatten the raw NCHW inputs (their native memory
    # order already matches the packed stage-1 weight rows) and fuse both
    # conv branches into ONE kernel operand.
    img = jnp.concatenate(
        [DOP.reshape(B, -1), host_DOP.reshape(B, -1)],
        axis=1).astype(jnp.bfloat16)                       # (B, 175 + 25)
    xf = x.astype(jnp.float32)
    n_out = p["out_w"].shape[1]
    return pl.pallas_call(
        _net_kernel,
        out_shape=jax.ShapeDtypeStruct((B, n_out), jnp.float32),
        in_specs=[_VMEM] * 9,
        out_specs=_VMEM,
    )(img, xf, p["w1"], p["w2"], p["h1_w"], p["h2_w"], p["h3_w"],
      p["out_w"], p["biases"])


# ----------------------------------- main -----------------------------------

if __name__ == "__main__":
    # Spatial size 5x5 so each conv branch flattens to 32 / 8 features,
    # matching the Linear(n_feature + 32 + 8, ...) contract of the module.
    B = 2
    n_feature, n_hidden_1, n_hidden_2, n_hidden_3, n_output = 8, 32, 32, 16, 4
    H = W = 5

    key = jax.random.PRNGKey(0)
    k_params, k_x, k_dop, k_host = jax.random.split(key, 4)

    params = init_params(k_params, n_feature, n_hidden_1, n_hidden_2,
                         n_hidden_3, n_output)
    prepped = prepare_params(params, n_feature)

    x = jax.random.normal(k_x, (B, n_feature), dtype=jnp.float32)
    DOP = jax.random.normal(k_dop, (B, 7, H, W), dtype=jnp.float32)
    host_DOP = jax.random.normal(k_host, (B, H, W), dtype=jnp.float32)

    out = net_forward(prepped, x, DOP, host_DOP)
    out = jax.block_until_ready(out)

    assert out.shape == (B, n_output)
    assert bool(jnp.all(jnp.isfinite(out)))
    assert bool(jnp.all((out >= 0.0) & (out <= 1.0)))   # sigmoid output range
    print("KERNEL_OK")
</pallas_src>

<mosaic_0001>
module attributes {stable_mosaic.version = 11 : i64} {
  func.func @_net_kernel(%arg0: memref<2x200xbf16, #tpu.memory_space<vmem>>, %arg1: memref<2x8xf32, #tpu.memory_space<vmem>>, %arg2: memref<200x512xbf16, #tpu.memory_space<vmem>>, %arg3: memref<128x512xbf16, #tpu.memory_space<vmem>>, %arg4: memref<48x32xbf16, #tpu.memory_space<vmem>>, %arg5: memref<32x32xbf16, #tpu.memory_space<vmem>>, %arg6: memref<32x16xbf16, #tpu.memory_space<vmem>>, %arg7: memref<16x4xbf16, #tpu.memory_space<vmem>>, %arg8: memref<6x128xf32, #tpu.memory_space<vmem>>, %arg9: memref<2x4xf32, #tpu.memory_space<vmem>>) attributes {dimension_semantics = [], scalar_prefetch = 0 : i64, scratch_operands = 0 : i64, tpu.core_type = #tpu.core_type<tc>} {
    %c0 = arith.constant 0 : index
    %c0_0 = arith.constant 0 : index
    %0 = vector.load %arg8[%c0, %c0_0] : memref<6x128xf32, #tpu.memory_space<vmem>>, vector<6x128xf32>
    %c0_1 = arith.constant 0 : index
    %c0_2 = arith.constant 0 : index
    %1 = vector.load %arg0[%c0_1, %c0_2] : memref<2x200xbf16, #tpu.memory_space<vmem>>, vector<2x200xbf16>
    %c0_3 = arith.constant 0 : index
    %c0_4 = arith.constant 0 : index
    %2 = vector.load %arg2[%c0_3, %c0_4] : memref<200x512xbf16, #tpu.memory_space<vmem>>, vector<200x512xbf16>
    %cst = arith.constant dense<0.000000e+00> : vector<2x512xf32>
    %3 = tpu.matmul %1, %2, %cst {dimension_numbers = #tpu.dot_dimension_numbers<[1], [0], [0], [1], [0, 0, 1, 1], [], []>} : vector<2x200xbf16>, vector<200x512xbf16>, vector<2x512xf32> -> vector<2x512xf32>
    %4 = vector.extract_strided_slice %3 {offsets = [0, 0], sizes = [2, 128], strides = [1, 1]} : vector<2x512xf32> to vector<2x128xf32>
    %5 = vector.extract_strided_slice %3 {offsets = [0, 128], sizes = [2, 128], strides = [1, 1]} : vector<2x512xf32> to vector<2x128xf32>
    %6 = arith.maximumf %4, %5 : vector<2x128xf32>
    %7 = vector.extract_strided_slice %3 {offsets = [0, 256], sizes = [2, 128], strides = [1, 1]} : vector<2x512xf32> to vector<2x128xf32>
    %8 = vector.extract_strided_slice %3 {offsets = [0, 384], sizes = [2, 128], strides = [1, 1]} : vector<2x512xf32> to vector<2x128xf32>
    %9 = arith.maximumf %7, %8 : vector<2x128xf32>
    %10 = arith.maximumf %6, %9 : vector<2x128xf32>
    %11 = vector.extract_strided_slice %0 {offsets = [0, 0], sizes = [1, 128], strides = [1, 1]} : vector<6x128xf32> to vector<1x128xf32>
    %12 = vector.broadcast %11 : vector<1x128xf32> to vector<2x128xf32>
    %13 = arith.addf %10, %12 : vector<2x128xf32>
    %cst_5 = arith.constant 0.000000e+00 : f32
    %14 = vector.broadcast %cst_5 : f32 to vector<2x128xf32>
    %15 = arith.maximumf %13, %14 : vector<2x128xf32>
    %16 = arith.truncf %15 : vector<2x128xf32> to vector<2x128xbf16>
    %c0_6 = arith.constant 0 : index
    %c0_7 = arith.constant 0 : index
    %17 = vector.load %arg3[%c0_6, %c0_7] : memref<128x512xbf16, #tpu.memory_space<vmem>>, vector<128x512xbf16>
    %cst_8 = arith.constant dense<0.000000e+00> : vector<2x512xf32>
    %18 = tpu.matmul %16, %17, %cst_8 {dimension_numbers = #tpu.dot_dimension_numbers<[1], [0], [0], [1], [0, 0, 1, 1], [], []>} : vector<2x128xbf16>, vector<128x512xbf16>, vector<2x512xf32> -> vector<2x512xf32>
    %19 = vector.extract_strided_slice %18 {offsets = [0, 0], sizes = [2, 128], strides = [1, 1]} : vector<2x512xf32> to vector<2x128xf32>
    %20 = vector.extract_strided_slice %18 {offsets = [0, 128], sizes = [2, 128], strides = [1, 1]} : vector<2x512xf32> to vector<2x128xf32>
    %21 = arith.maximumf %19, %20 : vector<2x128xf32>
    %22 = vector.extract_strided_slice %18 {offsets = [0, 256], sizes = [2, 128], strides = [1, 1]} : vector<2x512xf32> to vector<2x128xf32>
    %23 = vector.extract_strided_slice %18 {offsets = [0, 384], sizes = [2, 128], strides = [1, 1]} : vector<2x512xf32> to vector<2x128xf32>
    %24 = arith.maximumf %22, %23 : vector<2x128xf32>
    %25 = arith.maximumf %21, %24 : vector<2x128xf32>
    %26 = vector.extract_strided_slice %25 {offsets = [0, 0], sizes = [2, 40], strides = [1, 1]} : vector<2x128xf32> to vector<2x40xf32>
    %27 = vector.extract_strided_slice %0 {offsets = [1, 0], sizes = [1, 40], strides = [1, 1]} : vector<6x128xf32> to vector<1x40xf32>
    %28 = vector.broadcast %27 : vector<1x40xf32> to vector<2x40xf32>
    %29 = arith.addf %26, %28 : vector<2x40xf32>
    %cst_9 = arith.constant 0.000000e+00 : f32
    %30 = vector.broadcast %cst_9 : f32 to vector<2x40xf32>
    %31 = arith.maximumf %29, %30 : vector<2x40xf32>
    %c0_10 = arith.constant 0 : index
    %c0_11 = arith.constant 0 : index
    %32 = vector.load %arg1[%c0_10, %c0_11] : memref<2x8xf32, #tpu.memory_space<vmem>>, vector<2x8xf32>
    %33 = tpu.concatenate %32, %31 in 1 : vector<2x8xf32>, vector<2x40xf32> -> vector<2x48xf32>
    %34 = arith.truncf %33 : vector<2x48xf32> to vector<2x48xbf16>
    %c0_12 = arith.constant 0 : index
    %c0_13 = arith.constant 0 : index
    %35 = vector.load %arg4[%c0_12, %c0_13] : memref<48x32xbf16, #tpu.memory_space<vmem>>, vector<48x32xbf16>
    %cst_14 = arith.constant dense<0.000000e+00> : vector<2x32xf32>
    %36 = tpu.matmul %34, %35, %cst_14 {dimension_numbers = #tpu.dot_dimension_numbers<[1], [0], [0], [1], [0, 0, 1, 1], [], []>} : vector<2x48xbf16>, vector<48x32xbf16>, vector<2x32xf32> -> vector<2x32xf32>
    %37 = vector.extract_strided_slice %0 {offsets = [2, 0], sizes = [1, 32], strides = [1, 1]} : vector<6x128xf32> to vector<1x32xf32>
    %38 = vector.broadcast %37 : vector<1x32xf32> to vector<2x32xf32>
    %39 = arith.addf %36, %38 : vector<2x32xf32>
    %cst_15 = arith.constant 0.000000e+00 : f32
    %40 = vector.broadcast %cst_15 : f32 to vector<2x32xf32>
    %41 = arith.maximumf %39, %40 : vector<2x32xf32>
    %42 = arith.truncf %41 : vector<2x32xf32> to vector<2x32xbf16>
    %c0_16 = arith.constant 0 : index
    %c0_17 = arith.constant 0 : index
    %43 = vector.load %arg5[%c0_16, %c0_17] : memref<32x32xbf16, #tpu.memory_space<vmem>>, vector<32x32xbf16>
    %cst_18 = arith.constant dense<0.000000e+00> : vector<2x32xf32>
    %44 = tpu.matmul %42, %43, %cst_18 {dimension_numbers = #tpu.dot_dimension_numbers<[1], [0], [0], [1], [0, 0, 1, 1], [], []>} : vector<2x32xbf16>, vector<32x32xbf16>, vector<2x32xf32> -> vector<2x32xf32>
    %45 = vector.extract_strided_slice %0 {offsets = [3, 0], sizes = [1, 32], strides = [1, 1]} : vector<6x128xf32> to vector<1x32xf32>
    %46 = vector.broadcast %45 : vector<1x32xf32> to vector<2x32xf32>
    %47 = arith.addf %44, %46 : vector<2x32xf32>
    %cst_19 = arith.constant 0.000000e+00 : f32
    %48 = vector.broadcast %cst_19 : f32 to vector<2x32xf32>
    %49 = arith.maximumf %47, %48 : vector<2x32xf32>
    %50 = arith.truncf %49 : vector<2x32xf32> to vector<2x32xbf16>
    %c0_20 = arith.constant 0 : index
    %c0_21 = arith.constant 0 : index
    %51 = vector.load %arg6[%c0_20, %c0_21] : memref<32x16xbf16, #tpu.memory_space<vmem>>, vector<32x16xbf16>
    %cst_22 = arith.constant dense<0.000000e+00> : vector<2x16xf32>
    %52 = tpu.matmul %50, %51, %cst_22 {dimension_numbers = #tpu.dot_dimension_numbers<[1], [0], [0], [1], [0, 0, 1, 1], [], []>} : vector<2x32xbf16>, vector<32x16xbf16>, vector<2x16xf32> -> vector<2x16xf32>
    %53 = vector.extract_strided_slice %0 {offsets = [4, 0], sizes = [1, 16], strides = [1, 1]} : vector<6x128xf32> to vector<1x16xf32>
    %54 = vector.broadcast %53 : vector<1x16xf32> to vector<2x16xf32>
    %55 = arith.addf %52, %54 : vector<2x16xf32>
    %cst_23 = arith.constant 0.000000e+00 : f32
    %56 = vector.broadcast %cst_23 : f32 to vector<2x16xf32>
    %57 = arith.maximumf %55, %56 : vector<2x16xf32>
    %58 = arith.truncf %57 : vector<2x16xf32> to vector<2x16xbf16>
    %c0_24 = arith.constant 0 : index
    %c0_25 = arith.constant 0 : index
    %59 = vector.load %arg7[%c0_24, %c0_25] : memref<16x4xbf16, #tpu.memory_space<vmem>>, vector<16x4xbf16>
    %cst_26 = arith.constant dense<0.000000e+00> : vector<2x4xf32>
    %60 = tpu.matmul %58, %59, %cst_26 {dimension_numbers = #tpu.dot_dimension_numbers<[1], [0], [0], [1], [0, 0, 1, 1], [], []>} : vector<2x16xbf16>, vector<16x4xbf16>, vector<2x4xf32> -> vector<2x4xf32>
    %61 = vector.extract_strided_slice %0 {offsets = [5, 0], sizes = [1, 4], strides = [1, 1]} : vector<6x128xf32> to vector<1x4xf32>
    %62 = vector.broadcast %61 : vector<1x4xf32> to vector<2x4xf32>
    %63 = arith.addf %60, %62 : vector<2x4xf32>
    %cst_27 = arith.constant 0.000000e+00 : f32
    %64 = vector.broadcast %cst_27 : f32 to vector<2x4xf32>
    %65 = arith.subf %64, %63 : vector<2x4xf32>
    %66 = math.exp %65 : vector<2x4xf32>
    %cst_28 = arith.constant 1.000000e+00 : f32
    %67 = vector.broadcast %cst_28 : f32 to vector<2x4xf32>
    %68 = arith.addf %67, %66 : vector<2x4xf32>
    %cst_29 = arith.constant 1.000000e+00 : f32
    %69 = vector.broadcast %cst_29 : f32 to vector<2x4xf32>
    %70 = arith.divf %69, %68 : vector<2x4xf32>
    %c0_30 = arith.constant 0 : index
    %c0_31 = arith.constant 0 : index
    %71 = vector.load %arg9[%c0_30, %c0_31] : memref<2x4xf32, #tpu.memory_space<vmem>>, vector<2x4xf32>
    tpu.vector_store %arg9[%c0_30, %c0_31], %70 {strides = array<i32>} : memref<2x4xf32, #tpu.memory_space<vmem>>, vector<2x4xf32>,
    return
  }
}

</mosaic_0001>

<bundles_post_ra>
// kernel: net_forward.1
= control target key start
LH: loop header
LB: loop body
LE: loop exit
PB: predicated region body
PF: predicated region fallthrough
CT: control target
= control target key end

     0   :  { %14 = vsyncpa [#allocation3], 0  ;;  %s1603_s0 = inlined_call_operand.vmem [shape: bf16[2,200], index: 0, kind: input, shape index: {}]   ;;  %s1604_s1 = inlined_call_operand.vmem [shape: f32[2,8], index: 1, kind: input, shape index: {}]   ;;  %s1605_s2 = inlined_call_operand.hbm [shape: bf16[200,512], index: 2, kind: input, shape index: {}]   ;;  %s1606_s3 = inlined_call_operand.hbm [shape: bf16[128,512], index: 3, kind: input, shape index: {}]   ;;  %s1607_s4 = inlined_call_operand.vmem [shape: bf16[48,32], index: 4, kind: input, shape index: {}]   ;;  %s1608_s5 = inlined_call_operand.vmem [shape: bf16[32,32], index: 5, kind: input, shape index: {}]   ;;  %s1609_s6 = inlined_call_operand.vmem [shape: bf16[32,16], index: 6, kind: input, shape index: {}]   ;;  %s1610_s7 = inlined_call_operand.vmem [shape: bf16[16,4], index: 7, kind: input, shape index: {}]   ;;  %s1611_s8 = inlined_call_operand.vmem [shape: f32[6,128], index: 8, kind: input, shape index: {}]   ;;  %s1612_s9 = inlined_call_operand.hbm [shape: f32[2,4], index: 9, kind: output, shape index: {}]  }
   0x1   :  { %15 = vsyncpa [#allocation6], 0 }
   0x2   :  { %16 = vsyncpa [#allocation4], 0  ;;  %s25_s11 = sshll.u32 %s1605_s2, 4  ;;  %s1474_s12 = smov [#allocation2]   ;;  %s26_s11 = int_to_ptr.hbm [resolvable:$true] %s25_s11 }
   0x3   :  { %s27_s13 = sshll.u32 %s1474_s12, 4  ;;  %s38_s16 = sshll.u32 %s1606_s3, 4  ;;  %s28_s13 = int_to_ptr.vmem [resolvable:$true] %s27_s13  ;;  %s39_s16 = int_to_ptr.hbm [resolvable:$true] %s38_s16 }
   0x4   :  { %s1475_s17 = smov 256   ;;  %s1476_s18 = smov 16  }
   0x5   :  { %33 = dma.hbm_to_vmem [thread:$0]  %s26_s11, 6400, %s28_s13, [#allocation3], %s1475_s17, %s1475_s17, %s1476_s18  }
   0x6   :  { %s1477_s19 = smov [#allocation5]  }
   0x7   :  { %s40_s20 = sshll.u32 %s1477_s19, 4  ;;  %s41_s20 = int_to_ptr.vmem [resolvable:$true] %s40_s20 }
   0x8   :  { %46 = dma.hbm_to_vmem [thread:$0]  %s39_s16, 4096, %s41_s20, [#allocation6], %s1475_s17, %s1475_s17, %s1476_s18  }
   0x9   :  { %1468 = dma.done.wait [#allocation3], 6400  }
   0xa   :  { %1469 = vsyncadd [#allocation3], 4294960896 }
   0xb   :  { %1470 = dma.done.wait [#allocation6], 4096  }
   0xc   :  { %1471 = vsyncadd [#allocation6], 4294963200  ;;  %v1052_v0 = vld [vmem:[#allocation2 + $0xe0] sm:$0xf]  ;;  %v1328_v1 = vld [vmem:[#allocation2 + $0xec] sm:$0xf0] }
   0xd   :  { %v1326_v2 = vld [vmem:[#allocation2 + $0xe4] sm:$0xf]  ;;  %v1053_v3 = vor.u32 %v1328_v1, %v1052_v0  ;;  %v1054_v4 = vld [vmem:[#allocation2 + $0xf0] sm:$0xf0]  ;;  %v1036_v5 = vld [vmem:[#allocation2 + $0xc0] sm:$0xf] }
   0xe   :  { %v1324_v6 = vld [vmem:[#allocation2 + $0xcc] sm:$0xf0]  ;;  %v1057_v7 = vor.u32 %v1326_v2, %v1054_v4  ;;  %v116_v8 = vld [vmem:[#allocation2 + $0x180] sm:$0xff]  ;;  %v1038_v10 = vld [vmem:[#allocation2 + $0xd0] sm:$0xf0]  ;;  %vm376_vm0 = vcmask 1043456  }
   0xf   :  { %v1322_v9 = vld [vmem:[#allocation2 + $0xc4] sm:$0xf]  ;;  %389 = vmatpush.bf16.msra.mxu0 %v1053_v3  ;;  %v1037_v11 = vor.u32 %v1324_v6, %v1036_v5  ;;  %v269_v12 = vunpack.c.l.b16 %v116_v8  ;;  %v270_v13 = vunpack.c.h.b16 %v116_v8  ;;  %v1020_v15 = vld [vmem:[#allocation2 + $0xa0] sm:$0xf]  ;;  %v1320_v16 = vld [vmem:[#allocation2 + $0xac] sm:$0xf0] }
  0x10   :  { %415 = vmatpush.bf16.msra.mxu2 %v1057_v7  ;;  %v1041_v14 = vor.u32 %v1322_v9, %v1038_v10  ;;  %v1116_v17 = vld [vmem:[#allocation2 + $0x160] sm:$0xf]  ;;  %v1344_v19 = vld [vmem:[#allocation2 + $0x16c] sm:$0xf0]  ;;  %v1318_v20 = vld [vmem:[#allocation2 + $0xa4] sm:$0xf]  ;;  %v1021_v24 = vor.u32 %v1320_v16, %v1020_v15 }
  0x11   :  { %v321_v18 = vpack.c.b16 %v269_v12, %v269_v12  ;;  %v1022_v21 = vld [vmem:[#allocation2 + $0xb0] sm:$0xf0]  ;;  %v322_v22 = vpack.c.b16 %v270_v13, %v270_v13  ;;  %v1342_v26 = vld [vmem:[#allocation2 + $0x164] sm:$0xf]  ;;  %v1117_v28 = vor.u32 %v1344_v19, %v1116_v17  ;;  %v1004_v30 = vld [vmem:[#allocation2 + $0x80] sm:$0xf] }
  0x12   :  { %v1118_v27 = vld [vmem:[#allocation2 + $0x170] sm:$0xf0]  ;;  %v1025_v29 = vor.u32 %v1318_v20, %v1022_v21  ;;  %v1316_v31 = vld [vmem:[#allocation2 + $0x8c] sm:$0xf0]  ;;  %v1100_v32 = vld [vmem:[#allocation2 + $0x140] sm:$0xf] }
  0x13   :  { %390 = vmatpush.bf16.msra.mxu0 %v1037_v11  ;;  %v378_v23 = vsel %vm376_vm0, %v321_v18, 0  ;;  %v381_v25 = vsel %vm376_vm0, %v322_v22, 0  ;;  %v1340_v33 = vld [vmem:[#allocation2 + $0x14c] sm:$0xf0]  ;;  %v1314_v34 = vld [vmem:[#allocation2 + $0x84] sm:$0xf]  ;;  %v1121_v36 = vor.u32 %v1342_v26, %v1118_v27  ;;  %v1005_v39 = vor.u32 %v1316_v31, %v1004_v30 }
  0x14   :  { %405 = vmatpush.bf16.msra.mxu1 %v378_v23  ;;  %416 = vmatpush.bf16.msra.mxu2 %v1041_v14  ;;  %v1006_v35 = vld [vmem:[#allocation2 + $0x90] sm:$0xf0]  ;;  %v1338_v37 = vld [vmem:[#allocation2 + $0x144] sm:$0xf]  ;;  %v1101_v40 = vor.u32 %v1340_v33, %v1100_v32  ;;  %v988_v42 = vld [vmem:[#allocation2 + $0x60] sm:$0xf] }
  0x15   :  { %431 = vmatpush.bf16.msra.mxu3 %v381_v25  ;;  %v1102_v38 = vld [vmem:[#allocation2 + $0x150] sm:$0xf0]  ;;  %v1009_v41 = vor.u32 %v1314_v34, %v1006_v35  ;;  %v1312_v43 = vld [vmem:[#allocation2 + $0x6c] sm:$0xf0]  ;;  %v1084_v44 = vld [vmem:[#allocation2 + $0x120] sm:$0xf] }
  0x16   :  { %v1336_v45 = vld [vmem:[#allocation2 + $0x12c] sm:$0xf0]  ;;  %v1310_v46 = vld [vmem:[#allocation2 + $0x64] sm:$0xf]  ;;  %v990_v47 = vld [vmem:[#allocation2 + $0x70] sm:$0xf0]  ;;  %v1105_v48 = vor.u32 %v1338_v37, %v1102_v38  ;;  %v989_v51 = vor.u32 %v1312_v43, %v988_v42 }
  0x17   :  { %391 = vmatpush.bf16.msra.mxu0 %v1021_v24  ;;  %v1334_v49 = vld [vmem:[#allocation2 + $0x124] sm:$0xf]  ;;  %v1086_v50 = vld [vmem:[#allocation2 + $0x130] sm:$0xf0]  ;;  %v972_v52 = vld [vmem:[#allocation2 + $0x40] sm:$0xf]  ;;  %v1085_v54 = vor.u32 %v1336_v45, %v1084_v44  ;;  %v993_v55 = vor.u32 %v1310_v46, %v990_v47 }
  0x18   :  { %406 = vmatpush.bf16.msra.mxu1 %v1117_v28  ;;  %417 = vmatpush.bf16.msra.mxu2 %v1025_v29  ;;  %v1308_v53 = vld [vmem:[#allocation2 + $0x4c] sm:$0xf0]  ;;  %v1068_v56 = vld [vmem:[#allocation2 + $0x100] sm:$0xf]  ;;  %v117_v58 = vld [vmem:[#allocation2 + $0x188] sm:$0xff]  ;;  %v1089_v62 = vor.u32 %v1334_v49, %v1086_v50  ;;  %vm373_vm1 = vcmask 588800  }
  0x19   :  { %432 = vmatpush.bf16.msra.mxu3 %v1121_v36  ;;  %v1332_v57 = vld [vmem:[#allocation2 + $0x10c] sm:$0xf0]  ;;  %v1306_v59 = vld [vmem:[#allocation2 + $0x44] sm:$0xf]  ;;  %v974_v60 = vld [vmem:[#allocation2 + $0x50] sm:$0xf0]  ;;  %v271_v63 = vunpack.c.l.b16 %v117_v58  ;;  %v973_v3 = vor.u32 %v1308_v53, %v972_v52  ;;  %v272_v10 = vunpack.c.h.b16 %v117_v58 }
  0x1a   :  { %v1060_v61 = vld [vmem:[#allocation2 + $0xe8] sm:$0xf]  ;;  %v1329_v0 = vld [vmem:[#allocation2 + $0xf4] sm:$0xf0]  ;;  %v1330_v1 = vld [vmem:[#allocation2 + $0x104] sm:$0xf]  ;;  %v1069_v6 = vor.u32 %v1332_v57, %v1068_v56  ;;  %v977_v7 = vor.u32 %v1306_v59, %v974_v60 }
  0x1b   :  { %392 = vmatpush.bf16.msra.mxu0 %v1005_v39  ;;  %v1070_v2 = vld [vmem:[#allocation2 + $0x110] sm:$0xf0]  ;;  %v323_v4 = vpack.c.b16 %v271_v63, %v271_v63  ;;  %v67_v5 = vld [vmem:[%s1603_s0] sm:$0x3]  ;;  %v956_v8 = vld [vmem:[#allocation2 + $0x20] sm:$0xf]  ;;  %v1061_v11 = vor.u32 %v1329_v0, %v1060_v61  ;;  %v324_v25 = vpack.c.b16 %v272_v10, %v272_v10 }
  0x1c   :  { %407 = vmatpush.bf16.msra.mxu1 %v1101_v40  ;;  %418 = vmatpush.bf16.msra.mxu2 %v1009_v41  ;;  %v1304_v9 = vld [vmem:[#allocation2 + $0x2c] sm:$0xf0]  ;;  %119 = vst [vmem:[#allocation1] ss:$9 sm:$0xff] %v67_v5  ;;  %v1302_v12 = vld [vmem:[#allocation2 + $0x24] sm:$0xf]  ;;  %v1073_v14 = vor.u32 %v1330_v1, %v1070_v2 }
  0x1d   :  { %433 = vmatpush.bf16.msra.mxu3 %v1105_v48  ;;  %v958_v13 = vld [vmem:[#allocation2 + $0x30] sm:$0xf0]  ;;  %v1044_v15 = vld [vmem:[#allocation2 + $0xc8] sm:$0xf]  ;;  %v1325_v16 = vld [vmem:[#allocation2 + $0xd4] sm:$0xf0]  ;;  %v957_v17 = vor.u32 %v1304_v9, %v956_v8 }
  0x1e   :  { %v384_v18 = vsel %vm376_vm0, %v323_v4, 0  ;;  %v1124_v19 = vld [vmem:[#allocation2 + $0x168] sm:$0xf]  ;;  %v1345_v20 = vld [vmem:[#allocation2 + $0x174] sm:$0xf0]  ;;  %v961_v21 = vor.u32 %v1302_v12, %v958_v13  ;;  %v1045_v26 = vor.u32 %v1325_v16, %v1044_v15  ;;  %v387_v39 = vsel %vm376_vm0, %v324_v25, 0 }
  0x1f   :  { %393 = vmatpush.bf16.msra.mxu0 %v989_v51  ;;  %v940_v22 = vld [vmem:[#allocation2] sm:$0xf]  ;;  %v1300_v23 = vld [vmem:[#allocation2 + $0xc] sm:$0xf0]  ;;  %v1298_v24 = vld [vmem:[#allocation2 + $0x4] sm:$0xf]  ;;  %v1125_v32 = vor.u32 %v1345_v20, %v1124_v19 }
  0x20   :  { %408 = vmatpush.bf16.msra.mxu1 %v1085_v54  ;;  %419 = vmatpush.bf16.msra.mxu2 %v993_v55  ;;  %v942_v27 = vld [vmem:[#allocation2 + $0x10] sm:$0xf0]  ;;  %v1327_v28 = vld [vmem:[#allocation2 + $0xec] sm:$0xf]  ;;  %v1062_v29 = vld [vmem:[#allocation2 + $0xf8] sm:$0xf0]  ;;  %v941_v33 = vor.u32 %v1300_v23, %v940_v22 }
  0x21   :  { %434 = vmatpush.bf16.msra.mxu3 %v1089_v62  ;;  %v1028_v30 = vld [vmem:[#allocation2 + $0xa8] sm:$0xf]  ;;  %v1321_v31 = vld [vmem:[#allocation2 + $0xb4] sm:$0xf0]  ;;  %v945_v37 = vor.u32 %v1298_v24, %v942_v27  ;;  %v1065_v38 = vor.u32 %v1327_v28, %v1062_v29  ;;  %v1323_v42 = vld [vmem:[#allocation2 + $0xcc] sm:$0xf] }
  0x22   :  { %v1108_v35 = vld [vmem:[#allocation2 + $0x148] sm:$0xf]  ;;  %v1341_v36 = vld [vmem:[#allocation2 + $0x154] sm:$0xf0]  ;;  %v1029_v40 = vor.u32 %v1321_v31, %v1028_v30  ;;  %v1046_v43 = vld [vmem:[#allocation2 + $0xd8] sm:$0xf0] }
  0x23   :  { %394 = vmatpush.bf16.msra.mxu0 %v973_v3  ;;  %v1542_v34 = vld [vmem:[#allocation1 + $0x9] sm:$0xff]  ;;  %v1317_v44 = vld [vmem:[#allocation2 + $0x94] sm:$0xf0]  ;;  %v1343_v45 = vld [vmem:[#allocation2 + $0x16c] sm:$0xf]  ;;  %v1109_v47 = vor.u32 %v1341_v36, %v1108_v35  ;;  %v1049_v51 = vor.u32 %v1323_v42, %v1046_v43  ;;  %s1478_s27 = smov 8  }
  0x24   :  { %409 = vmatpush.bf16.msra.mxu1 %v1069_v6  ;;  %420 = vmatpush.bf16.msra.mxu2 %v977_v7  ;;  %v1012_v41 = vld [vmem:[#allocation2 + $0x88] sm:$0xf]  ;;  %v1126_v46 = vld [vmem:[#allocation2 + $0x178] sm:$0xf0]  ;;  %v1337_v49 = vld [vmem:[#allocation2 + $0x134] sm:$0xf0] }
  0x25   :  { %435 = vmatpush.bf16.msra.mxu3 %v1073_v14  ;;  %v1092_v48 = vld [vmem:[#allocation2 + $0x128] sm:$0xf]  ;;  %v1549_v50 = vld [vmem:[#allocation1] sm:$0xff]  ;;  %v1013_v52 = vor.u32 %v1317_v44, %v1012_v41  ;;  %v1129_v53 = vor.u32 %v1343_v45, %v1126_v46  ;;  %v1319_v55 = vld [vmem:[#allocation2 + $0xac] sm:$0xf]  ;;  %vm755_vm2 = vcmask 64512  }
  0x26   :  { %v996_v54 = vld [vmem:[#allocation2 + $0x68] sm:$0xf]  ;;  %v1030_v56 = vld [vmem:[#allocation2 + $0xb8] sm:$0xf0]  ;;  %v1313_v57 = vld [vmem:[#allocation2 + $0x74] sm:$0xf0]  ;;  %v1093_v60 = vor.u32 %v1337_v49, %v1092_v48 }
  0x27   :  { %395 = vmatpush.bf16.msra.mxu0 %v957_v17  ;;  %1130 = vmatmul.msk.bf16.vlgmr.msra.gmra.mxu1 %vm373_vm1, %v1542_v34  ;;  %v1339_v58 = vld [vmem:[#allocation2 + $0x14c] sm:$0xf]  ;;  %v1110_v59 = vld [vmem:[#allocation2 + $0x158] sm:$0xf0]  ;;  %v1076_v61 = vld [vmem:[#allocation2 + $0x108] sm:$0xf]  ;;  %v1033_v63 = vor.u32 %v1319_v55, %v1030_v56  ;;  %v997_v0 = vor.u32 %v1313_v57, %v996_v54 }
  0x28   :  { %441 = vmatpush.bf16.msrb.mxu1 %v1061_v11  ;;  %421 = vmatpush.bf16.msra.mxu2 %v961_v21  ;;  %v1333_v62 = vld [vmem:[#allocation2 + $0x114] sm:$0xf0]  ;;  %v1113_v1 = vor.u32 %v1339_v58, %v1110_v59  ;;  %v980_v2 = vld [vmem:[#allocation2 + $0x48] sm:$0xf]  ;;  %v1315_v3 = vld [vmem:[#allocation2 + $0x8c] sm:$0xf] }
  0x29   :  { %457 = vmatpush.bf16.msrb.mxu3 %v384_v18  ;;  %v1014_v4 = vld [vmem:[#allocation2 + $0x98] sm:$0xf0]  ;;  %v1309_v5 = vld [vmem:[#allocation2 + $0x54] sm:$0xf0]  ;;  %v1335_v6 = vld [vmem:[#allocation2 + $0x12c] sm:$0xf]  ;;  %v1077_v8 = vor.u32 %v1333_v62, %v1076_v61 }
  0x2a   :  { %1131 = vmatmul.msk.bf16.vlgmr.msra.gmra.mxu3 %vm373_vm1, %v1542_v34  ;;  %v1094_v7 = vld [vmem:[#allocation2 + $0x138] sm:$0xf0]  ;;  %v1017_v9 = vor.u32 %v1315_v3, %v1014_v4  ;;  %v981_v10 = vor.u32 %v1309_v5, %v980_v2  ;;  %v964_v12 = vld [vmem:[#allocation2 + $0x28] sm:$0xf]  ;;  %v1311_v13 = vld [vmem:[#allocation2 + $0x6c] sm:$0xf] }
  0x2b   :  { %396 = vmatpush.bf16.msra.mxu0 %v941_v33  ;;  %v1097_v11 = vor.u32 %v1335_v6, %v1094_v7  ;;  %v998_v14 = vld [vmem:[#allocation2 + $0x78] sm:$0xf0]  ;;  %v1305_v15 = vld [vmem:[#allocation2 + $0x34] sm:$0xf0]  ;;  %v1331_v16 = vld [vmem:[#allocation2 + $0x10c] sm:$0xf] }
  0x2c   :  { %442 = vmatpush.bf16.msrb.mxu1 %v1045_v26  ;;  %422 = vmatpush.bf16.msra.mxu2 %v945_v37  ;;  %v1078_v17 = vld [vmem:[#allocation2 + $0x118] sm:$0xf0]  ;;  %v1001_v18 = vor.u32 %v1311_v13, %v998_v14  ;;  %v965_v19 = vor.u32 %v1305_v15, %v964_v12  ;;  %v1307_v21 = vld [vmem:[#allocation2 + $0x4c] sm:$0xf]  ;;  %v948_v23 = vld [vmem:[#allocation2 + $0x8] sm:$0xf] }
  0x2d   :  { %458 = vmatpush.bf16.msrb.mxu3 %v1125_v32  ;;  %v1081_v20 = vor.u32 %v1331_v16, %v1078_v17  ;;  %v982_v22 = vld [vmem:[#allocation2 + $0x58] sm:$0xf0]  ;;  %v1301_v24 = vld [vmem:[#allocation2 + $0x14] sm:$0xf0]  ;;  %v1303_v27 = vld [vmem:[#allocation2 + $0x2c] sm:$0xf] }
  0x2e   :  { %397 = vmatmul.bf16.vlgmr.msra.gmra.mxu0 %v1549_v50  ;;  %v985_v25 = vor.u32 %v1307_v21, %v982_v22  ;;  %v949_v26 = vor.u32 %v1301_v24, %v948_v23  ;;  %v966_v28 = vld [vmem:[#allocation2 + $0x38] sm:$0xf0]  ;;  %v1299_v30 = vld [vmem:[#allocation2 + $0xc] sm:$0xf]  ;;  %v1248_v33 = vld [vmem:[#allocation5 + $0xe0] sm:$0xf] }
  0x2f   :  { %467 = vmatpush.bf16.msrb.mxu0 %v1065_v38  ;;  %423 = vmatmul.bf16.vlgmr.msra.gmra.mxu2 %v1549_v50  ;;  %v969_v29 = vor.u32 %v1303_v27, %v966_v28  ;;  %v950_v31 = vld [vmem:[#allocation2 + $0x18] sm:$0xf0]  ;;  %v1376_v35 = vld [vmem:[#allocation5 + $0xec] sm:$0xf0]  ;;  %v1374_v36 = vld [vmem:[#allocation5 + $0xe4] sm:$0xf] }
  0x30   :  { %443 = vmatpush.bf16.msrb.mxu1 %v1029_v40  ;;  %483 = vmatpush.bf16.msrb.mxu2 %v387_v39  ;;  %v953_v32 = vor.u32 %v1299_v30, %v950_v31  ;;  %v1249_v37 = vor.u32 %v1376_v35, %v1248_v33  ;;  %v1250_v38 = vld [vmem:[#allocation5 + $0xf0] sm:$0xf0]  ;;  %v1256_v39 = vld [vmem:[#allocation5 + $0xe8] sm:$0xf]  ;;  %v1377_v40 = vld [vmem:[#allocation5 + $0xf4] sm:$0xf0] }
  0x31   :  { %459 = vmatpush.bf16.msrb.mxu3 %v1109_v47  ;;  %v1257_v41 = vor.u32 %v1377_v40, %v1256_v39  ;;  %v1375_v42 = vld [vmem:[#allocation5 + $0xec] sm:$0xf]  ;;  %v1258_v43 = vld [vmem:[#allocation5 + $0xf8] sm:$0xf0]  ;;  %v1232_v45 = vld [vmem:[#allocation5 + $0xc0] sm:$0xf] }
  0x32   :  { %v1261_v44 = vor.u32 %v1375_v42, %v1258_v43  ;;  %v1372_v46 = vld [vmem:[#allocation5 + $0xcc] sm:$0xf0]  ;;  %v1370_v47 = vld [vmem:[#allocation5 + $0xc4] sm:$0xf]  ;;  %v1234_v49 = vld [vmem:[#allocation5 + $0xd0] sm:$0xf0] }
  0x33   :  { %468 = vmatpush.bf16.msrb.mxu0 %v1049_v51  ;;  %v1233_v48 = vor.u32 %v1372_v46, %v1232_v45  ;;  %v1373_v51 = vld [vmem:[#allocation5 + $0xd4] sm:$0xf0]  ;;  %v1371_v54 = vld [vmem:[#allocation5 + $0xcc] sm:$0xf]  ;;  %v1242_v55 = vld [vmem:[#allocation5 + $0xd8] sm:$0xf0] }
  0x34   :  { %444 = vmatpush.bf16.msrb.mxu1 %v1013_v52  ;;  %484 = vmatpush.bf16.msrb.mxu2 %v1129_v53  ;;  %v1237_v52 = vor.u32 %v1370_v47, %v1234_v49  ;;  %v1216_v56 = vld [vmem:[#allocation5 + $0xa0] sm:$0xf]  ;;  %v1245_v57 = vor.u32 %v1371_v54, %v1242_v55  ;;  %v1368_v58 = vld [vmem:[#allocation5 + $0xac] sm:$0xf0]  ;;  %v1366_v59 = vld [vmem:[#allocation5 + $0xa4] sm:$0xf] }
  0x35   :  { %460 = vmatpush.bf16.msrb.mxu3 %v1093_v60  ;;  %v1218_v60 = vld [vmem:[#allocation5 + $0xb0] sm:$0xf0]  ;;  %v1217_v61 = vor.u32 %v1368_v58, %v1216_v56  ;;  %v1226_v3 = vld [vmem:[#allocation5 + $0xb8] sm:$0xf0]  ;;  %v1200_v5 = vld [vmem:[#allocation5 + $0x80] sm:$0xf] }
  0x36   :  { %v1221_v62 = vor.u32 %v1366_v59, %v1218_v60  ;;  %v1364_v6 = vld [vmem:[#allocation5 + $0x8c] sm:$0xf0]  ;;  %v1362_v7 = vld [vmem:[#allocation5 + $0x84] sm:$0xf]  ;;  %v1363_v14 = vld [vmem:[#allocation5 + $0x8c] sm:$0xf] }
  0x37   :  { %469 = vmatpush.bf16.msrb.mxu0 %v1033_v63  ;;  %v1224_v63 = vld [vmem:[#allocation5 + $0xa8] sm:$0xf]  ;;  %v1210_v15 = vld [vmem:[#allocation5 + $0x98] sm:$0xf0]  ;;  %v1184_v17 = vld [vmem:[#allocation5 + $0x60] sm:$0xf] }
  0x38   :  { %445 = vmatpush.bf16.msrb.mxu1 %v997_v0  ;;  %485 = vmatpush.bf16.msrb.mxu2 %v1113_v1  ;;  %v1369_v0 = vld [vmem:[#allocation5 + $0xb4] sm:$0xf0]  ;;  %v1367_v1 = vld [vmem:[#allocation5 + $0xac] sm:$0xf]  ;;  %v1213_v16 = vor.u32 %v1363_v14, %v1210_v15  ;;  %v1186_v21 = vld [vmem:[#allocation5 + $0x70] sm:$0xf0] }
  0x39   :  { %461 = vmatpush.bf16.msrb.mxu3 %v1077_v8  ;;  %v1225_v2 = vor.u32 %v1369_v0, %v1224_v63  ;;  %v1229_v4 = vor.u32 %v1367_v1, %v1226_v3  ;;  %v1201_v8 = vor.u32 %v1364_v6, %v1200_v5  ;;  %v1192_v22 = vld [vmem:[#allocation5 + $0x68] sm:$0xf]  ;;  %v1361_v23 = vld [vmem:[#allocation5 + $0x74] sm:$0xf0]  ;;  %v1194_v27 = vld [vmem:[#allocation5 + $0x78] sm:$0xf0] }
  0x3a   :  { %v1168_v30 = vld [vmem:[#allocation5 + $0x40] sm:$0xf]  ;;  %v1356_v31 = vld [vmem:[#allocation5 + $0x4c] sm:$0xf0]  ;;  %v1170_v35 = vld [vmem:[#allocation5 + $0x50] sm:$0xf0] }
  0x3b   :  { %470 = vmatpush.bf16.msrb.mxu0 %v1017_v9  ;;  %v1202_v9 = vld [vmem:[#allocation5 + $0x90] sm:$0xf0]  ;;  %v1169_v33 = vor.u32 %v1356_v31, %v1168_v30  ;;  %v1355_v39 = vld [vmem:[#allocation5 + $0x4c] sm:$0xf]  ;;  %v1178_v40 = vld [vmem:[#allocation5 + $0x58] sm:$0xf0] }
  0x3c   :  { %446 = vmatpush.bf16.msrb.mxu1 %v981_v10  ;;  %486 = vmatpush.bf16.msrb.mxu2 %v1097_v11  ;;  %v1208_v10 = vld [vmem:[#allocation5 + $0x88] sm:$0xf]  ;;  %v1365_v11 = vld [vmem:[#allocation5 + $0x94] sm:$0xf0]  ;;  %v1205_v12 = vor.u32 %v1362_v7, %v1202_v9  ;;  %v1181_v43 = vor.u32 %v1355_v39, %v1178_v40  ;;  %v1352_v45 = vld [vmem:[#allocation5 + $0x2c] sm:$0xf0] }
  0x3d   :  { %1132 = vmatmul.msk.bf16.vlgmr.msrb.gmra.mxu3 %vm373_vm1, %v1542_v34  ;;  %v1209_v13 = vor.u32 %v1365_v11, %v1208_v10  ;;  %v1350_v46 = vld [vmem:[#allocation5 + $0x24] sm:$0xf]  ;;  %v1160_v49 = vld [vmem:[#allocation5 + $0x28] sm:$0xf]  ;;  %v1348_v58 = vld [vmem:[#allocation5 + $0xc] sm:$0xf0] }
  0x3e   :  { %692 = vmatpush.bf16.msra.mxu3 %v1249_v37  ;;  %v1346_v59 = vld [vmem:[#allocation5 + $0x4] sm:$0xf]  ;;  %v1349_v63 = vld [vmem:[#allocation5 + $0x14] sm:$0xf0]  ;;  %v1347_v3 = vld [vmem:[#allocation5 + $0xc] sm:$0xf] }
  0x3f   :  { %471 = vmatpush.bf16.msrb.mxu0 %v1001_v18  ;;  %v1360_v18 = vld [vmem:[#allocation5 + $0x6c] sm:$0xf0]  ;;  %v1378_v31 = vld [vmem:[%s1607_s4] sm:$0xff]  ;;  %vm783_vm3 = vcmask 392192   ;;  %vm819_vm4 = vcmask 261120   ;;  %vm882_vm5 = vcmask 130048  }
  0x40   :  { %447 = vmatpush.bf16.msrb.mxu1 %v965_v19  ;;  %487 = vmatpush.bf16.msrb.mxu2 %v1081_v20  ;;  %v1358_v19 = vld [vmem:[#allocation5 + $0x64] sm:$0xf]  ;;  %v1185_v20 = vor.u32 %v1360_v18, %v1184_v17  ;;  %v1379_v30 = vld [vmem:[%s1607_s4 + $0x8] sm:$0xff]  ;;  %s927_s18 = sshll.u32 %s1612_s9, 4  ;;  %vm918_vm9 = vcmask 25600   ;;  %s928_s18 = int_to_ptr.hbm [resolvable:$true] %s927_s18 }
  0x41   :  { %v1189_v24 = vor.u32 %v1358_v19, %v1186_v21 }
  0x42   :  { %693 = vmatpush.bf16.msra.mxu3 %v1233_v48  ;;  %v1154_v48 = vld [vmem:[#allocation5 + $0x30] sm:$0xf0] }
  0x43   :  { %1133 = vmatmul.msk.bf16.vlgmr.msrb.gmra.mxu2 %vm373_vm1, %v1542_v34  ;;  %472 = vmatpush.bf16.msrb.mxu0 %v985_v25  ;;  %v1253_v34 = vor.u32 %v1374_v36, %v1250_v38  ;;  %v1193_v25 = vor.u32 %v1361_v23, %v1192_v22  ;;  %v1176_v36 = vld [vmem:[#allocation5 + $0x48] sm:$0xf]  ;;  %v1357_v38 = vld [vmem:[#allocation5 + $0x54] sm:$0xf0] }
  0x44   :  { %448 = vmatpush.bf16.msrb.mxu1 %v949_v26  ;;  %718 = vmatpush.bf16.msra.mxu2 %v1257_v41  ;;  %v1359_v26 = vld [vmem:[#allocation5 + $0x6c] sm:$0xf]  ;;  %v1177_v42 = vor.u32 %v1357_v38, %v1176_v36 }
  0x45   :  { %v1197_v28 = vor.u32 %v1359_v26, %v1194_v27 }
  0x46   :  { %694 = vmatpush.bf16.msra.mxu3 %v1217_v61  ;;  %v1138_v61 = vld [vmem:[#allocation5 + $0x10] sm:$0xf0] }
  0x47   :  { %449 = vmatmul.bf16.vlgmr.msrb.gmra.mxu1 %v1549_v50  ;;  %473 = vmatpush.bf16.msrb.mxu0 %v969_v29  ;;  %v1141_v1 = vor.u32 %v1346_v59, %v1138_v61 }
  0x48   :  { %705 = vmatpush.bf16.msra.mxu1 %v1253_v34 }
  0x4a   :  { %695 = vmatpush.bf16.msra.mxu3 %v1201_v8 }
  0x4b   :  { %474 = vmatpush.bf16.msrb.mxu0 %v953_v32  ;;  %v1354_v32 = vld [vmem:[#allocation5 + $0x44] sm:$0xf] }
  0x4c   :  { %706 = vmatpush.bf16.msra.mxu1 %v1237_v52  ;;  %v1173_v37 = vor.u32 %v1354_v32, %v1170_v35  ;;  %v1351_v52 = vld [vmem:[#allocation5 + $0x2c] sm:$0xf] }
  0x4e   :  { %475 = vmatmul.bf16.vlgmr.msrb.gmra.mxu0 %v1549_v50  ;;  %v1240_v50 = vld [vmem:[#allocation5 + $0xc8] sm:$0xf]  ;;  %696 = vmatpush.bf16.msra.mxu3 %v1185_v20 }
  0x4f   :  { %731 = vmatpush.bf16.msra.mxu0 %v1261_v44  ;;  %v1241_v53 = vor.u32 %v1373_v51, %v1240_v50  ;;  %v1152_v44 = vld [vmem:[#allocation5 + $0x20] sm:$0xf]  ;;  %v1157_v50 = vor.u32 %v1350_v46, %v1154_v48  ;;  %v1353_v51 = vld [vmem:[#allocation5 + $0x34] sm:$0xf0]  ;;  %v1382_v46 = vld [vmem:[%s1608_s5 + $0x8] sm:$0xff] }
  0x50   :  { %707 = vmatpush.bf16.msra.mxu1 %v1221_v62  ;;  %v1153_v47 = vor.u32 %v1352_v45, %v1152_v44  ;;  %v1161_v55 = vor.u32 %v1353_v51, %v1160_v49  ;;  %v1144_v62 = vld [vmem:[#allocation5 + $0x8] sm:$0xf] }
  0x51   :  { %719 = vmatpush.bf16.msra.mxu2 %v1241_v53  ;;  %v1162_v53 = vld [vmem:[#allocation5 + $0x38] sm:$0xf0]  ;;  %v750_v48 = vld [vmem:[%s1604_s1] sm:$0x3] }
  0x52   :  { %697 = vmatpush.bf16.msra.mxu3 %v1169_v33  ;;  %v1165_v56 = vor.u32 %v1351_v52, %v1162_v53  ;;  %v1384_v52 = vld [vmem:[%s1609_s6 + $0x8] sm:$0xff]  ;;  %v1383_v53 = vld [vmem:[%s1609_s6] sm:$0xff]  ;;  %s1479_s6 = smov [#allocation7]  }
  0x53   :  { %732 = vmatpush.bf16.msra.mxu0 %v1245_v57  ;;  %v1136_v57 = vld [vmem:[#allocation5] sm:$0xf] }
  0x54   :  { %708 = vmatpush.bf16.msra.mxu1 %v1205_v12  ;;  %v1137_v60 = vor.u32 %v1348_v58, %v1136_v57 }
  0x55   :  { %720 = vmatpush.bf16.msra.mxu2 %v1225_v2  ;;  %v1145_v2 = vor.u32 %v1349_v63, %v1144_v62 }
  0x56   :  { %698 = vmatpush.bf16.msra.mxu3 %v1153_v47  ;;  %v1381_v47 = vld [vmem:[%s1608_s5] sm:$0xff] }
  0x57   :  { %733 = vmatpush.bf16.msra.mxu0 %v1229_v4  ;;  %v1146_v4 = vld [vmem:[#allocation5 + $0x18] sm:$0xf0] }
  0x58   :  { %709 = vmatpush.bf16.msra.mxu1 %v1189_v24  ;;  %v1149_v7 = vor.u32 %v1347_v3, %v1146_v4 }
  0x59   :  { %721 = vmatpush.bf16.msra.mxu2 %v1209_v13 }
  0x5a   :  { %699 = vmatpush.bf16.msra.mxu3 %v1137_v60  ;;  %v1385_v60 = vld [vmem:[%s1610_s7] sm:$0xff]  ;;  %s925_s7 = sshll.u32 %s1479_s6, 4  ;;  %s926_s7 = int_to_ptr.vmem [resolvable:$true] %s925_s7 }
  0x5b   :  { %734 = vmatpush.bf16.msra.mxu0 %v1213_v16  ;;  %v1565_v16 = vld [vmem:[%s1611_s8] sm:$0x3f] }
  0x5c   :  { %710 = vmatpush.bf16.msra.mxu1 %v1173_v37  ;;  %v496_v22 = vperm.slane %v1565_v16, 0  ;;  %v747_v40 = vperm.slane %v1565_v16, 1  ;;  %v806_v61 = vperm.slane %v1565_v16, 3  ;;  %v842_v3 = vperm.slane %v1565_v16, 4 }
  0x5d   :  { %722 = vmatpush.bf16.msra.mxu2 %v1193_v25 }
  0x5f   :  { %735 = vmatpush.bf16.msra.mxu0 %v1197_v28 }
  0x60   :  { %711 = vmatpush.bf16.msra.mxu1 %v1157_v50 }
  0x61   :  { %723 = vmatpush.bf16.msra.mxu2 %v1177_v42 }
  0x63   :  { %736 = vmatpush.bf16.msra.mxu0 %v1181_v43 }
  0x64   :  { %712 = vmatpush.bf16.msra.mxu1 %v1141_v1 }
  0x65   :  { %724 = vmatpush.bf16.msra.mxu2 %v1161_v55 }
  0x67   :  { %737 = vmatpush.bf16.msra.mxu0 %v1165_v56 }
  0x68   :  { %829 = vmatpush.bf16.msrb.mxu1 %v1382_v46 }
  0x69   :  { %725 = vmatpush.bf16.msra.mxu2 %v1145_v2 }
  0x6b   :  { %738 = vmatpush.bf16.msra.mxu0 %v1149_v7 }
  0x6c   :  { %830 = vmatpush.bf16.msrb.mxu1 %v1381_v47 }
  0x6d   :  { %864 = vmatpush.bf16.msrb.mxu2 %v1384_v52 }
  0x71   :  { %865 = vmatpush.bf16.msrb.mxu2 %v1383_v53 }
  0xa4   :  { %v1559_v29 = vpop.f32.mrf.mxu1 }
  0xab   :  { %v398_v34 = vpop.f32.mrf.mxu0 }
  0xac   :  { %v413_v54 = vpop.f32.mrf.mxu1  ;;  %v412_v13 = vadd.f32 %v1559_v29, %v398_v34  ;;  %v1380_v29 = vld [vmem:[%s1607_s4 + $0x10] sm:$0xff] }
  0xad   :  { %v437_v41 = vpop.f32.mrf.mxu3  ;;  %792 = vmatpush.bf16.msrb.mxu3 %v1380_v29  ;;  %v764_v54 = vperm.slane %v1565_v16, 2 }
  0xb1   :  { %793 = vmatpush.bf16.msrb.mxu3 %v1379_v30 }
  0xb2   :  { %v424_v0 = vpop.f32.mrf.mxu2 }
  0xb3   :  { %v400_v5 = vpop.f32.mrf.mxu0  ;;  %v438_v14 = vadd.f32 %v437_v41, %v424_v0 }
  0xb5   :  { %v439_v6 = vpop.f32.mrf.mxu3  ;;  %v493_v20 = vmax.f32 %v412_v13, %v438_v14  ;;  %794 = vmatpush.bf16.msrb.mxu3 %v1378_v31 }
  0xba   :  { %v426_v8 = vpop.f32.mrf.mxu2 }
  0xc0   :  { %v463_v9 = vpop.f32.mrf.mxu3 }
  0xc4   :  { %v450_v10 = vpop.f32.mrf.mxu1 }
  0xc5   :  { %v464_v15 = vadd.f32 %v463_v9, %v450_v10  ;;  %v875_v9 = vperm.slane %v1565_v16, 5 }
  0xc6   :  { %v489_v11 = vpop.f32.mrf.mxu2 }
  0xc8   :  { %v465_v12 = vpop.f32.mrf.mxu3 }
  0xcb   :  { %v476_v17 = vpop.f32.mrf.mxu0 }
  0xcc   :  { %v452_v18 = vpop.f32.mrf.mxu1  ;;  %v490_v19 = vadd.f32 %v489_v11, %v476_v17 }
  0xce   :  { %v494_v21 = vmax.f32 %v464_v15, %v490_v19  ;;  %v491_v23 = vpop.f32.mrf.mxu2 }
  0xd0   :  { %v495_v24 = vmax.f32 %v493_v20, %v494_v21 }
  0xd2   :  { %v497_v25 = vadd.f32 %v496_v22, %v495_v24 }
  0xd3   :  { %v478_v26 = vpop.f32.mrf.mxu0 }
  0xd4   :  { %v498_v27 = vmax.f32 %v497_v25, 0.0 }
  0xd6   :  { %v499_v28 = vpack.c.bf16 %v498_v27, %v498_v27 }
  0xd8   :  { %700 = vmatmul.bf16.vlgmr.msra.gmra.mxu3 %v499_v28  ;;  %713 = vmatmul.bf16.vlgmr.msra.gmra.mxu1 %v499_v28 }
  0xd9   :  { %726 = vmatmul.bf16.vlgmr.msra.gmra.mxu2 %v499_v28  ;;  %739 = vmatmul.bf16.vlgmr.msra.gmra.mxu0 %v499_v28 }
  0xda   :  { %893 = vmatpush.bf16.msra.mxu3 %v1385_v60 }
 0x155   :  { %v714_v32 = vpop.f32.mrf.mxu1 }
 0x156   :  { %v740_v33 = vpop.f32.mrf.mxu0 }
 0x15b   :  { %v701_v35 = vpop.f32.mrf.mxu3 }
 0x15c   :  { %v744_v36 = vmax.f32 %v701_v35, %v714_v32  ;;  %v727_v37 = vpop.f32.mrf.mxu2 }
 0x15d   :  { %v745_v38 = vmax.f32 %v727_v37, %v740_v33  ;;  %v716_v39 = vpop.f32.mrf.mxu1 }
 0x15e   :  { %v742_v34 = vpop.f32.mrf.mxu0 }
 0x15f   :  { %v746_v41 = vmax.f32 %v744_v36, %v745_v38 }
 0x161   :  { %v748_v42 = vadd.f32 %v747_v40, %v746_v41 }
 0x163   :  { %v703_v43 = vpop.f32.mrf.mxu3  ;;  %v749_v44 = vmax.f32 %v748_v42, 0.0 }
 0x164   :  { %v729_v45 = vpop.f32.mrf.mxu2 }
 0x165   :  { %752 = vrot.lane.b32.xlu0 %v749_v44, %s1478_s27 }
 0x1d7   :  { %v753_v49 = vpop.permute.xlu0 %752 }
 0x1d8   :  { %v756_v50 = vsel %vm755_vm2, %v750_v48, %v753_v49 }
 0x1d9   :  { %v757_v51 = vpack.c.bf16 %v756_v50, %v756_v50 }
 0x1db   :  { %1274 = vmatmul.msk.bf16.vlgmr.msrb.gmra.mxu3 %vm783_vm3, %v757_v51 }
 0x25e   :  { %v796_v55 = vpop.f32.mrf.mxu3 }
 0x25f   :  { %v797_v56 = vadd.f32 %v796_v55, %v764_v54 }
 0x261   :  { %v800_v57 = vmax.f32 %v797_v56, 0.0 }
 0x263   :  { %v801_v58 = vpack.c.bf16 %v800_v57, %v800_v57 }
 0x265   :  { %1283 = vmatmul.msk.bf16.vlgmr.msrb.gmra.mxu1 %vm819_vm4, %v801_v58 }
 0x266   :  { %v798_v59 = vpop.f32.mrf.mxu3 }
 0x2e2   :  { %v832_v62 = vpop.f32.mrf.mxu1 }
 0x2e3   :  { %v833_v63 = vadd.f32 %v832_v62, %v806_v61 }
 0x2e5   :  { %v836_v0 = vmax.f32 %v833_v63, 0.0 }
 0x2e7   :  { %v837_v1 = vpack.c.bf16 %v836_v0, %v836_v0 }
 0x2e9   :  { %1292 = vmatmul.msk.bf16.vlgmr.msrb.gmra.mxu2 %vm819_vm4, %v837_v1 }
 0x2ea   :  { %v834_v2 = vpop.f32.mrf.mxu1 }
 0x36c   :  { %v867_v4 = vpop.f32.mrf.mxu2 }
 0x36d   :  { %v868_v5 = vadd.f32 %v867_v4, %v842_v3 }
 0x36f   :  { %v871_v6 = vmax.f32 %v868_v5, 0.0 }
 0x371   :  { %v872_v7 = vpack.c.bf16 %v871_v6, %v871_v6 }
 0x373   :  { %1297 = vmatmul.msk.bf16.vlgmr.msra.gmra.mxu3 %vm882_vm5, %v872_v7 }
 0x374   :  { %v869_v8 = vpop.f32.mrf.mxu2 }
 0x3f6   :  { %v895_v10 = vpop.f32.mrf.mxu3 }
 0x3f7   :  { %v896_v11 = vadd.f32 %v895_v10, %v875_v9 }
 0x3f9   :  { %v899_v12 = vsub.f32 0.0, %v896_v11 }
 0x3fb   :  { %v900_v13 = vmul.f32 1.442695, %v899_v12 }
 0x3fd   :  { %1392 = vpow2.f32 %v900_v13 }
 0x3fe   :  { %v897_v14 = vpop.f32.mrf.mxu3 }
 0x403   :  { %v1393_v15 = vpop.eup %1392 }
 0x404   :  { %v902_v17 = vadd.f32 1.0, %v1393_v15 }
 0x406   :  { %1394 = vrcp.f32 %v902_v17  ;;  %v914_v21 = vand.u32 2147483648, %v902_v17  ;;  %v912_v23 = vand.u32 2147483647, %v902_v17  ;;  %vm908_vm7 = vweird.f32 %v902_v17 }
 0x408   :  { %v915_v24 = vor.u32 1.1754944e-38, %v914_v21  ;;  %vm913_vm10 = vcmp.eq.f32.partialorder %v912_v23, 8.507059e+37 }
 0x40c   :  { %v1395_v18 = vpop.eup %1394 }
 0x40d   :  { %v904_v19 = vmul.f32 %v1395_v18, %v902_v17  ;;  %vm909_vm6 = vweird.f32 %v1395_v18 }
 0x40e   :  { %vm910_vm8 = vmor %vm908_vm7, %vm909_vm6 }
 0x40f   :  { %v905_v20 = vsub.f32 1.0, %v904_v19 }
 0x411   :  { %v906_v22 = vmul.f32 %v1395_v18, %v905_v20 }
 0x413   :  { %v907_v16 = vadd.f32 %v1395_v18, %v906_v22 }
 0x415   :  { %v911_v25 = vsel %vm910_vm8, %v1395_v18, %v907_v16 }
 0x416   :  { %v916_v26 = vsel %vm913_vm10, %v915_v24, %v911_v25 }
 0x417   :  { %919 = vst.msk [vmem:[#allocation7] sm:$0x3] %vm918_vm9, %v916_v26 }
 0x418   :  { %930 = dma.vmem_to_hbm [thread:$0]  %s926_s7, 32, %s928_s18, [#allocation4]  }
 0x419   :  { %1472 = dma.done.wait [#allocation4], 32  }
 0x41a   :  { %1473 = vsyncadd [#allocation4], 4294967264 }
 0x41b   :  { %935 = vsyncpa [#allocation3], 1 }
 0x41c   :  { %936 = vsyncpa [#allocation6], 1 }
 0x41d   :  { %937 = vsyncpa [#allocation4], 1 }

</bundles_post_ra>
